<compile_context>
chip_gen: v7x
topology: tpu7x:2x2x1
jax: 0.10.0
libtpu: 0.0.40
codegen_flags: <defaults>
</compile_context>

<pallas_src>
import math

import jax
import jax.numpy as jnp
from jax.experimental import pallas as pl
from jax.experimental.pallas import tpu as pltpu

_LANES = 128
_MAX_BLOCK_BYTES = 8 * 1024 * 1024  # hard cap per block (safety for odd shapes)


def _target_block_bytes() -> int:
    """Pick a per-block byte target based on the TPU generation."""
    try:
        kind = jax.devices()[0].device_kind.lower()
    except Exception:  # pragma: no cover - defensive
        return 2 * 1024 * 1024
    # v5e has a 16 MiB default scoped-VMEM budget -> keep blocks at ~2 MiB.
    if "v5 lite" in kind or "v5lite" in kind or "v5e" in kind:
        return 2 * 1024 * 1024
    # v6e / v7x: bigger blocks hide the ~0.35us per-grid-step overhead.
    return 4 * 1024 * 1024


def _scale_rows_kernel(x_ref, s_ref, o_ref):
    # x_ref: (tile_rows, lane), s_ref: (tile_rows, 1) -> broadcast multiply.
    o_ref[...] = x_ref[...] * s_ref[...]


def drop_path_pallas(x, *, drop_prob: float = 0.0, training: bool = False,
                     scale_by_keep: bool = True, key=None):
    """Pallas implementation of drop_path(). x is (B, ...) e.g. NCHW."""
    if drop_prob == 0.0 or not training:
        return x
    if key is None:
        raise ValueError("drop_path_pallas requires an explicit PRNG `key` "
                         "when training with drop_prob > 0.")

    keep_prob = 1.0 - float(drop_prob)
    B = x.shape[0]
    M = math.prod(x.shape[1:])
    if M == 0:
        return x

    # Per-sample Bernoulli(keep_prob) folded into a per-sample scale:
    #   kept   -> 1/keep_prob (or 1.0 if not scale_by_keep / keep_prob == 0)
    #   dropped-> 0.0
    keep = jax.random.bernoulli(key, p=keep_prob, shape=(B,))
    scale_val = (1.0 / keep_prob) if (keep_prob > 0.0 and scale_by_keep) else 1.0
    scale = jnp.where(keep, jnp.float32(scale_val), jnp.float32(0.0)).astype(x.dtype)

    itemsize = jnp.dtype(x.dtype).itemsize

    if M % _LANES == 0:
        # Packed lane-dense path: whole batch as (B*rows, 128); free reshape.
        rows_per_sample = M // _LANES
        total_rows = B * rows_per_sample
        lane = _LANES
        x2 = x.reshape(total_rows, lane)
        row_scale = jnp.broadcast_to(
            scale[:, None], (B, rows_per_sample)).reshape(total_rows, 1)
    else:
        # Feature size not a multiple of 128: keep the whole flattened sample
        # as the (full-extent) lane dim -> no pad/slice HBM copies; boundary
        # lane stores are masked but traffic is exactly read+write of x.
        total_rows = B
        lane = M
        x2 = x.reshape(B, lane)
        row_scale = scale.reshape(B, 1)

    bytes_per_row = lane * itemsize
    target = _target_block_bytes()

    tile_rows = max(1, target // bytes_per_row)
    if tile_rows >= total_rows:
        tile_rows = total_rows                      # full extent (always legal)
    else:
        tile_rows = max(8, (tile_rows // 8) * 8)    # multiple of 8 sublanes

    # If everything landed in a single block but it's big enough to matter,
    # split in two so a megacore part (v7x) gets balanced work.
    if (pl.cdiv(total_rows, tile_rows) == 1 and total_rows >= 16
            and total_rows * bytes_per_row >= (1 << 20)):
        tile_rows = ((total_rows // 2 + 7) // 8) * 8

    if tile_rows * bytes_per_row > _MAX_BLOCK_BYTES:
        # TODO(synk): very large non-128-divisible samples; a single fused XLA
        # broadcast-multiply is already HBM-bandwidth bound, so use it rather
        # than an oversized / illegal Pallas block.
        bshape = (B,) + (1,) * (x.ndim - 1)
        return x * scale.reshape(bshape)

    grid = (pl.cdiv(total_rows, tile_rows),)

    out = pl.pallas_call(
        _scale_rows_kernel,
        out_shape=jax.ShapeDtypeStruct(x2.shape, x2.dtype),
        grid=grid,
        in_specs=[
            pl.BlockSpec((tile_rows, lane), lambda m: (m, 0)),
            pl.BlockSpec((tile_rows, 1), lambda m: (m, 0)),
        ],
        out_specs=pl.BlockSpec((tile_rows, lane), lambda m: (m, 0)),
        compiler_params=pltpu.CompilerParams(
            dimension_semantics=("parallel",),
            vmem_limit_bytes=32 * 1024 * 1024,
        ),
    )(x2, row_scale)

    return out.reshape(x.shape)


if __name__ == "__main__":
    key = jax.random.PRNGKey(0)
    xkey, mkey = jax.random.split(key)

    # Small NCHW input consistent with the module's forward.
    x = jax.random.normal(xkey, (2, 4, 16, 16), dtype=jnp.float32)

    drop_prob = 0.5
    keep_prob = 1.0 - drop_prob

    # Eval path (identity) — matches drop_prob==0 / not training.
    y_eval = drop_path_pallas(x, drop_prob=drop_prob, training=False)
    assert jnp.array_equal(y_eval, x)

    # Training path — per-sample stochastic depth with 1/keep_prob scaling.
    y_train = drop_path_pallas(x, drop_prob=drop_prob, training=True,
                               scale_by_keep=True, key=mkey)
    y_train = jax.block_until_ready(y_train)

    # Reference: same mask, same semantics as the PyTorch module.
    keep_ref = jax.random.bernoulli(mkey, p=keep_prob, shape=(x.shape[0],))
    rand = keep_ref.astype(x.dtype) / keep_prob
    y_ref = x * rand.reshape(-1, 1, 1, 1)
    assert jnp.allclose(y_train, y_ref, rtol=1e-6, atol=1e-6)

    # Sanity: each sample is either all-zero or exactly x / keep_prob.
    for b in range(x.shape[0]):
        yb, xb = y_train[b], x[b]
        is_drop = bool(jnp.all(yb == 0.0))
        is_keep = bool(jnp.allclose(yb, xb / keep_prob, rtol=1e-6, atol=1e-6))
        assert is_drop or is_keep, "per-sample mask semantics violated"

    # Non-128-divisible feature size (M = 3*5*7 = 105): exercised through the
    # full-extent lane path (no pad/slice copies).
    x_odd = jax.random.normal(xkey, (4, 3, 5, 7), dtype=jnp.float32)
    p_odd = 0.25
    y_odd = drop_path_pallas(x_odd, drop_prob=p_odd, training=True,
                             scale_by_keep=True, key=mkey)
    keep_odd = jax.random.bernoulli(mkey, p=1.0 - p_odd, shape=(x_odd.shape[0],))
    ref_odd = x_odd * (keep_odd.astype(x_odd.dtype) / (1.0 - p_odd)).reshape(-1, 1, 1, 1)
    assert jnp.allclose(y_odd, ref_odd, rtol=1e-6, atol=1e-6)

    # No-rescale variant.
    y_nr = drop_path_pallas(x, drop_prob=drop_prob, training=True,
                            scale_by_keep=False, key=mkey)
    ref_nr = x * keep_ref.astype(x.dtype).reshape(-1, 1, 1, 1)
    assert jnp.allclose(y_nr, ref_nr, rtol=1e-6, atol=1e-6)

    # Edge case: drop_prob=1.0 must give all zeros, no NaN (0/0 guard).
    y_all_drop = drop_path_pallas(x, drop_prob=1.0, training=True,
                                  scale_by_keep=True, key=mkey)
    assert bool(jnp.all(y_all_drop == 0.0))

    print("KERNEL_OK")
</pallas_src>

<mosaic_0001>
module attributes {stable_mosaic.version = 11 : i64} {
  func.func @_scale_rows_kernel(%arg0: i32, %arg1: memref<16x128xf32, #tpu.memory_space<vmem>>, %arg2: memref<16x1xf32, #tpu.memory_space<vmem>>, %arg3: memref<16x128xf32, #tpu.memory_space<vmem>>) attributes {dimension_semantics = [#tpu.dimension_semantics<parallel>], iteration_bounds = array<i64: 1>, scalar_prefetch = 0 : i64, scratch_operands = 0 : i64, tpu.core_type = #tpu.core_type<tc>, window_params = [{transform_indices = @transform_0, window_bounds = array<i64: 16, 128>}, {transform_indices = @transform_1, window_bounds = array<i64: 16, 1>}, {transform_indices = @transform_2, window_bounds = array<i64: 16, 128>}]} {
    %c0 = arith.constant 0 : index
    %c0_0 = arith.constant 0 : index
    %0 = vector.load %arg1[%c0, %c0_0] : memref<16x128xf32, #tpu.memory_space<vmem>>, vector<16x128xf32>
    %c0_1 = arith.constant 0 : index
    %c0_2 = arith.constant 0 : index
    %1 = vector.load %arg2[%c0_1, %c0_2] : memref<16x1xf32, #tpu.memory_space<vmem>>, vector<16x1xf32>
    %2 = vector.broadcast %1 : vector<16x1xf32> to vector<16x128xf32>
    %3 = arith.mulf %0, %2 : vector<16x128xf32>
    %c0_3 = arith.constant 0 : index
    %c0_4 = arith.constant 0 : index
    %4 = vector.load %arg3[%c0_3, %c0_4] : memref<16x128xf32, #tpu.memory_space<vmem>>, vector<16x128xf32>
    tpu.vector_store %arg3[%c0_3, %c0_4], %3 {strides = array<i32>} : memref<16x128xf32, #tpu.memory_space<vmem>>, vector<16x128xf32>,
    return
  }
  func.func @transform_0(%arg0: i32) -> (i32, i32) {
    %c0_i32 = arith.constant 0 : i32
    %c0_i32_0 = arith.constant 0 : i32
    return %arg0, %c0_i32 : i32, i32
  }
  func.func @transform_1(%arg0: i32) -> (i32, i32) {
    %c0_i32 = arith.constant 0 : i32
    %c0_i32_0 = arith.constant 0 : i32
    return %arg0, %c0_i32 : i32, i32
  }
  func.func @transform_2(%arg0: i32) -> (i32, i32) {
    %c0_i32 = arith.constant 0 : i32
    %c0_i32_0 = arith.constant 0 : i32
    return %arg0, %c0_i32 : i32, i32
  }
}

</mosaic_0001>

<bundles_post_ra>
// kernel: tpu_custom_call.1
= control target key start
LH: loop header
LB: loop body
LE: loop exit
PB: predicated region body
PF: predicated region fallthrough
CT: control target
= control target key end

     0   :  { %s118_s0 = inlined_call_operand.vmem [shape: f32[16,128], index: 0, kind: input, shape index: {}]   ;;  %s119_s1 = inlined_call_operand.vmem [shape: f32[16,1], index: 1, kind: input, shape index: {}]   ;;  %s120_s2 = inlined_call_operand.hbm [shape: f32[16,128], index: 2, kind: output, shape index: {}]  }
   0x1   :  { %v14_v0 = vld [vmem:[%s119_s1] sm:$0xff] }
   0x2   :  { %7 = vsyncpa [#allocation3], 0  ;;  %v75_v1 = vmov 0   ;;  %v15_v2 = vld [vmem:[%s119_s1 + $0x8] sm:$0xff]  ;;  %v12_v3 = vld [vmem:[%s118_s0] sm:$0xff]  ;;  %s76_s15 = smov [#allocation2]  }
   0x3   :  { %50 = vset.pattern.permute.xlu0 %v75_v1  ;;  %s35_s16 = sshll.u32 %s76_s15, 4  ;;  %v13_v6 = vld [vmem:[%s118_s0 + $0x8] sm:$0xff]  ;;  %s36_s16 = int_to_ptr.vmem [resolvable:$true] %s35_s16 }
   0x4   :  { %18 = vperm.xlu0 %50, %v14_v0   ;;  %s51_s19 = scalar_lea.vmem %s36_s16, 256  ;;  %p56_p1 = scmp.lt.s32.totalorder %s36_s16, %s36_s16 }
   0x5   :  { %p52_p0 = scmp.ne.s32.totalorder %s36_s16, %s51_s19  ;;  %p57_p2 = scmp.lt.s32.totalorder %s51_s19, %s51_s19 }
   0x7   :  { %p58_p3 = por %p57_p2, %p56_p1 }
   0x8   :  { %23 = vperm.xlu0 %50, %v15_v2  }
   0x9   :  { %p59_p4 = pnand %p58_p3, %p52_p0 }
  0x83   :  { %v19_v4 = vpop.permute.xlu0 %18 }
  0x84   :  { %v26_v5 = vmul.f32 %v19_v4, %v12_v3 }
  0x86   :  { %28 = vst [vmem:[#allocation2] sm:$0xff] %v26_v5 }
  0x87   :  { %v24_v7 = vpop.permute.xlu0 %23 }
  0x88   :  { %v27_v8 = vmul.f32 %v24_v7, %v13_v6 }
  0x8a   :  { %29 = vst [vmem:[#allocation2 + $0x8] sm:$0xff] %v27_v8 }
  0x8b   :  { %62 = shalt.err (!%p59_p4)
}
  0x8c   :  { %s63_s21 = scalar_lea.hbm %s120_s2, 256 }
  0x8d   :  { %p64_p5 = scmp.ne.s32.totalorder %s120_s2, %s63_s21  ;;  %p67_p6 = scmp.lt.u32.totalorder %s63_s21, %s120_s2 }
  0x8f   :  { %p69_p7 = pnand %p67_p6, %p64_p5 }
  0x91   :  { %72 = shalt.err (!%p69_p7)
}
  0x92   :  { %s77_s25 = smov 128   ;;  %s78_s26 = smov 8  }
  0x93   :  { %41 = dma.vmem_to_hbm [thread:$0]  %s36_s16, 256, %s120_s2, [#allocation3], %s77_s25, %s77_s25, %s78_s26  }
  0x94   :  { %73 = dma.done.wait [#allocation3], 256  }
  0x95   :  { %74 = vsyncadd [#allocation3], 4294967040 }
  0x96   :  { %45 = vsyncpa [#allocation3], 1 }

</bundles_post_ra>
